<compile_context>
chip_gen: v5e
topology: v5e:2x2
jax: 0.10.0
libtpu: 0.0.40
codegen_flags: <defaults>
</compile_context>

<pallas_src>
import jax
import jax.numpy as jnp
from jax.experimental import pallas as pl
from jax.experimental.pallas import tpu as pltpu


def _round_up(n, m):
    return ((n + m - 1) // m) * m


def _mlp_kernel(xT_ref, w1T_ref, b1_ref, w2_ref, b2_ref, oT_ref):
    """One batch tile; batch is on the lane axis.

    xT : [in, Bt]      (compute dtype)
    w1T: [hidden, in]  (compute dtype)    b1: [hidden, 1] (compute dtype)
    w2 : [hidden, out] (compute dtype)    b2: [out, 1]    (float32)
    oT : [out, Bt]     (float32)
    """
    in_size = xT_ref.shape[0]
    out_size = w2_ref.shape[1]

    xT = xT_ref[...]
    w1T = w1T_ref[...]
    b1 = b1_ref[...]
    w2 = w2_ref[...]
    b2 = b2_ref[...]

    # ---- Layer 1: hidden^T = relu(w1T @ xT + b1) ------------------------
    # K = in_size is tiny (2): an MXU pass would be <2% utilized, so do it
    # as VPU broadcast multiply-adds (static tiny unroll over k).
    hT = w1T[:, 0:1] * xT[0:1, :]
    for k in range(1, in_size):
        hT = hT + w1T[:, k:k + 1] * xT[k:k + 1, :]
    hT = jnp.maximum(hT + b1, 0.0)                       # ReLU, [hidden, Bt]

    # ---- Layer 2: y^T = w2^T @ hidden^T + b2 -----------------------------
    # N = out_size is tiny (1): elementwise multiply + sublane (XLU) reduce,
    # accumulated in f32 regardless of compute dtype.
    rows = []
    for o in range(out_size):
        prod = (w2[:, o:o + 1] * hT).astype(jnp.float32)  # [hidden, Bt]
        rows.append(jnp.sum(prod, axis=0, keepdims=True) + b2[o:o + 1, :])
    yT = rows[0] if out_size == 1 else jnp.concatenate(rows, axis=0)

    oT_ref[...] = yT.astype(oT_ref.dtype)


def nnet_regression_forward(x, w1_pt, b1_pt, w2_pt, b2_pt, *,
                            block_b=32768,
                            compute_dtype=jnp.float32,
                            x_feature_major=False):
    """Forward pass of Linear(in,hidden) -> ReLU -> Linear(hidden,out).

    Params in PyTorch nn.Linear layout:
      w1_pt: [hidden, in], b1_pt: [hidden], w2_pt: [out, hidden], b2_pt: [out]
    x: [B, in] float32 (or [in, B] if x_feature_major=True).
    Returns [B, out] float32.
    """
    if x_feature_major:
        in_size, B = x.shape
        xT = x                                   # already [in, B]: no HBM transpose pass
    else:
        B, in_size = x.shape
        xT = x.T                                 # [in, B] (one-time wrapper layout pass)

    hidden_size = w1_pt.shape[0]
    out_size = w2_pt.shape[0]

    cdt = jnp.dtype(compute_dtype)
    xT = xT.astype(cdt)
    w1T = w1_pt.astype(cdt)                      # [hidden, in]
    b1 = b1_pt.reshape(hidden_size, 1).astype(cdt)
    w2 = w2_pt.T.astype(cdt)                     # [hidden, out]
    b2 = b2_pt.reshape(out_size, 1).astype(jnp.float32)

    # ---- Batch-tile sizing -------------------------------------------------
    # Always a multiple of 128 (lane-dense, satisfies the (8,128) constraint).
    tile_b = _round_up(min(block_b, B), 128)
    # Keep >= 2 grid steps when the batch allows it so v7x megacore can split
    # the "parallel" batch axis across its two TensorCores.
    if B > 128 and tile_b >= _round_up(B, 128):
        tile_b = _round_up(-(-B // 2), 128)

    # VMEM budget: blocks are sublane-padded to 8 rows and double-buffered;
    # the [hidden, Bt] intermediate also lives in VMEM. Bytes per lane:
    hid_pad = _round_up(hidden_size, 8)
    bytes_per_lane = (2 * 8 * cdt.itemsize        # x block, 2 buffers, 8-sublane padded
                      + 2 * 8 * 4                 # y block (f32), 2 buffers, padded
                      + 3 * hid_pad * 4)          # hT + temps (conservative, f32)
    budget = 40 << 20                             # headroom under v7x's 64 MiB physical
    max_tile = max(128, (budget // bytes_per_lane) // 128 * 128)
    tile_b = min(tile_b, max_tile)

    Bp = _round_up(B, tile_b)
    if Bp != B:
        xT = jnp.pad(xT, ((0, 0), (0, Bp - B)))   # padded cols sliced off below

    grid = (Bp // tile_b,)
    vmem_limit = int(min(max(bytes_per_lane * tile_b + (2 << 20), 32 << 20), 48 << 20))
    vmem = pltpu.MemorySpace.VMEM

    yT = pl.pallas_call(
        _mlp_kernel,
        out_shape=jax.ShapeDtypeStruct((out_size, Bp), jnp.float32),
        grid=grid,
        in_specs=[
            # streamed, lane-dense input blocks
            pl.BlockSpec((in_size, tile_b), lambda i: (0, i), memory_space=vmem),
            # resident weights / biases (same block every grid step)
            pl.BlockSpec((hidden_size, in_size), lambda i: (0, 0), memory_space=vmem),
            pl.BlockSpec((hidden_size, 1), lambda i: (0, 0), memory_space=vmem),
            pl.BlockSpec((hidden_size, out_size), lambda i: (0, 0), memory_space=vmem),
            pl.BlockSpec((out_size, 1), lambda i: (0, 0), memory_space=vmem),
        ],
        out_specs=pl.BlockSpec((out_size, tile_b), lambda i: (0, i), memory_space=vmem),
        compiler_params=pltpu.CompilerParams(
            dimension_semantics=("parallel",),
            vmem_limit_bytes=vmem_limit),
    )(xT, w1T, b1, w2, b2)

    return yT[:, :B].T                            # back to [B, out] (free for out=1)


def init_params(key, in_size, hidden_size, out_size):
    """PyTorch nn.Linear-style init: uniform(-1/sqrt(fan_in), 1/sqrt(fan_in))."""
    k1, k2, k3, k4 = jax.random.split(key, 4)
    bound1 = 1.0 / (in_size ** 0.5)
    bound2 = 1.0 / (hidden_size ** 0.5)
    w1 = jax.random.uniform(k1, (hidden_size, in_size), jnp.float32, -bound1, bound1)
    b1 = jax.random.uniform(k2, (hidden_size,), jnp.float32, -bound1, bound1)
    w2 = jax.random.uniform(k3, (out_size, hidden_size), jnp.float32, -bound2, bound2)
    b2 = jax.random.uniform(k4, (out_size,), jnp.float32, -bound2, bound2)
    return w1, b1, w2, b2


def _reference(x, w1, b1, w2, b2):
    h = jnp.maximum(x @ w1.T + b1, 0.0)
    return h @ w2.T + b2


if __name__ == "__main__":
    # The lab uses 2 input features (df.iloc[:, 0:2]), a hidden layer, and a
    # single regression output.
    in_size, hidden_size, out_size = 2, 32, 1

    key = jax.random.PRNGKey(0)
    kx, kp, kx2, kx3 = jax.random.split(key, 4)
    w1, b1, w2, b2 = init_params(kp, in_size, hidden_size, out_size)

    # Small demo batch (matches module usage), f32 path.
    x = jax.random.normal(kx, (8, in_size), dtype=jnp.float32)
    y = nnet_regression_forward(x, w1, b1, w2, b2)
    jax.block_until_ready(y)
    assert y.shape == (8, out_size)
    assert jnp.allclose(y, _reference(x, w1, b1, w2, b2), atol=1e-5, rtol=1e-5)

    # Multi-tile streaming + batch padding (forces a 3-step grid).
    x_big = jax.random.normal(kx2, (260, in_size), dtype=jnp.float32)
    y_big = nnet_regression_forward(x_big, w1, b1, w2, b2, block_b=128)
    jax.block_until_ready(y_big)
    assert y_big.shape == (260, out_size)
    assert jnp.allclose(y_big, _reference(x_big, w1, b1, w2, b2), atol=1e-5, rtol=1e-5)

    # Default (large-tile) path with the >=2-step megacore split and padding.
    x_med = jax.random.normal(kx3, (1000, in_size), dtype=jnp.float32)
    y_med = nnet_regression_forward(x_med, w1, b1, w2, b2)
    jax.block_until_ready(y_med)
    assert y_med.shape == (1000, out_size)
    assert jnp.allclose(y_med, _reference(x_med, w1, b1, w2, b2), atol=1e-5, rtol=1e-5)

    # Optional bf16 compute path (v6e/v7x VALU win); f32 layer-2 accumulate,
    # checked against the f32 reference with a loose tolerance.
    y_bf16 = nnet_regression_forward(x_big, w1, b1, w2, b2,
                                     compute_dtype=jnp.bfloat16)
    jax.block_until_ready(y_bf16)
    assert y_bf16.shape == (260, out_size)
    assert jnp.allclose(y_bf16, _reference(x_big, w1, b1, w2, b2),
                        atol=1e-1, rtol=1e-1)

    print("KERNEL_OK")
</pallas_src>

<mosaic_0001>
module attributes {stable_mosaic.version = 11 : i64} {
  func.func @_mlp_kernel(%arg0: i32, %arg1: memref<2x128xf32, #tpu.memory_space<vmem>>, %arg2: memref<32x2xf32, #tpu.memory_space<vmem>>, %arg3: memref<32x1xf32, #tpu.memory_space<vmem>>, %arg4: memref<32x1xf32, #tpu.memory_space<vmem>>, %arg5: memref<1x1xf32, #tpu.memory_space<vmem>>, %arg6: memref<1x128xf32, #tpu.memory_space<vmem>>) attributes {dimension_semantics = [#tpu.dimension_semantics<parallel>], iteration_bounds = array<i64: 1>, scalar_prefetch = 0 : i64, scratch_operands = 0 : i64, tpu.core_type = #tpu.core_type<tc>, window_params = [{transform_indices = @transform_0, window_bounds = array<i64: 2, 128>}, {pipeline_mode = #tpu.pipeline_mode<synchronous>, transform_indices = @transform_1, window_bounds = array<i64: 32, 2>}, {pipeline_mode = #tpu.pipeline_mode<synchronous>, transform_indices = @transform_2, window_bounds = array<i64: 32, 1>}, {pipeline_mode = #tpu.pipeline_mode<synchronous>, transform_indices = @transform_3, window_bounds = array<i64: 32, 1>}, {pipeline_mode = #tpu.pipeline_mode<synchronous>, transform_indices = @transform_4, window_bounds = array<i64: 1, 1>}, {transform_indices = @transform_5, window_bounds = array<i64: 1, 128>}]} {
    %c0 = arith.constant 0 : index
    %c0_0 = arith.constant 0 : index
    %0 = vector.load %arg1[%c0, %c0_0] : memref<2x128xf32, #tpu.memory_space<vmem>>, vector<2x128xf32>
    %c0_1 = arith.constant 0 : index
    %c0_2 = arith.constant 0 : index
    %1 = vector.load %arg2[%c0_1, %c0_2] : memref<32x2xf32, #tpu.memory_space<vmem>>, vector<32x2xf32>
    %c0_3 = arith.constant 0 : index
    %c0_4 = arith.constant 0 : index
    %2 = vector.load %arg3[%c0_3, %c0_4] : memref<32x1xf32, #tpu.memory_space<vmem>>, vector<32x1xf32>
    %c0_5 = arith.constant 0 : index
    %c0_6 = arith.constant 0 : index
    %3 = vector.load %arg4[%c0_5, %c0_6] : memref<32x1xf32, #tpu.memory_space<vmem>>, vector<32x1xf32>
    %c0_7 = arith.constant 0 : index
    %c0_8 = arith.constant 0 : index
    %4 = vector.load %arg5[%c0_7, %c0_8] : memref<1x1xf32, #tpu.memory_space<vmem>>, vector<1x1xf32>
    %5 = vector.extract_strided_slice %1 {offsets = [0, 0], sizes = [32, 1], strides = [1, 1]} : vector<32x2xf32> to vector<32x1xf32>
    %6 = vector.extract_strided_slice %0 {offsets = [0, 0], sizes = [1, 128], strides = [1, 1]} : vector<2x128xf32> to vector<1x128xf32>
    %7 = vector.broadcast %5 : vector<32x1xf32> to vector<32x128xf32>
    %8 = vector.broadcast %6 : vector<1x128xf32> to vector<32x128xf32>
    %9 = arith.mulf %7, %8 : vector<32x128xf32>
    %10 = vector.extract_strided_slice %1 {offsets = [0, 1], sizes = [32, 1], strides = [1, 1]} : vector<32x2xf32> to vector<32x1xf32>
    %11 = vector.extract_strided_slice %0 {offsets = [1, 0], sizes = [1, 128], strides = [1, 1]} : vector<2x128xf32> to vector<1x128xf32>
    %12 = vector.broadcast %10 : vector<32x1xf32> to vector<32x128xf32>
    %13 = vector.broadcast %11 : vector<1x128xf32> to vector<32x128xf32>
    %14 = arith.mulf %12, %13 : vector<32x128xf32>
    %15 = arith.addf %9, %14 : vector<32x128xf32>
    %16 = vector.broadcast %2 : vector<32x1xf32> to vector<32x128xf32>
    %17 = arith.addf %15, %16 : vector<32x128xf32>
    %cst = arith.constant 0.000000e+00 : f32
    %18 = vector.broadcast %cst : f32 to vector<32x128xf32>
    %19 = arith.maximumf %17, %18 : vector<32x128xf32>
    %20 = vector.broadcast %3 : vector<32x1xf32> to vector<32x128xf32>
    %21 = arith.mulf %20, %19 : vector<32x128xf32>
    %cst_9 = arith.constant dense<0.000000e+00> : vector<128xf32>
    %22 = vector.multi_reduction <add>, %21, %cst_9 [0] : vector<32x128xf32> to vector<128xf32>
    %23 = vector.shape_cast %22 : vector<128xf32> to vector<1x128xf32>
    %24 = vector.broadcast %4 : vector<1x1xf32> to vector<1x128xf32>
    %25 = arith.addf %23, %24 : vector<1x128xf32>
    %c0_10 = arith.constant 0 : index
    %c0_11 = arith.constant 0 : index
    %26 = vector.load %arg6[%c0_10, %c0_11] : memref<1x128xf32, #tpu.memory_space<vmem>>, vector<1x128xf32>
    tpu.vector_store %arg6[%c0_10, %c0_11], %25 {strides = array<i32>} : memref<1x128xf32, #tpu.memory_space<vmem>>, vector<1x128xf32>,
    return
  }
  func.func @transform_0(%arg0: i32) -> (i32, i32) {
    %c0_i32 = arith.constant 0 : i32
    %c0_i32_0 = arith.constant 0 : i32
    return %c0_i32, %arg0 : i32, i32
  }
  func.func @transform_1(%arg0: i32) -> (i32, i32) {
    %c0_i32 = arith.constant 0 : i32
    %c0_i32_0 = arith.constant 0 : i32
    %c0_i32_1 = arith.constant 0 : i32
    return %c0_i32, %c0_i32_0 : i32, i32
  }
  func.func @transform_2(%arg0: i32) -> (i32, i32) {
    %c0_i32 = arith.constant 0 : i32
    %c0_i32_0 = arith.constant 0 : i32
    %c0_i32_1 = arith.constant 0 : i32
    return %c0_i32, %c0_i32_0 : i32, i32
  }
  func.func @transform_3(%arg0: i32) -> (i32, i32) {
    %c0_i32 = arith.constant 0 : i32
    %c0_i32_0 = arith.constant 0 : i32
    %c0_i32_1 = arith.constant 0 : i32
    return %c0_i32, %c0_i32_0 : i32, i32
  }
  func.func @transform_4(%arg0: i32) -> (i32, i32) {
    %c0_i32 = arith.constant 0 : i32
    %c0_i32_0 = arith.constant 0 : i32
    %c0_i32_1 = arith.constant 0 : i32
    return %c0_i32, %c0_i32_0 : i32, i32
  }
  func.func @transform_5(%arg0: i32) -> (i32, i32) {
    %c0_i32 = arith.constant 0 : i32
    %c0_i32_0 = arith.constant 0 : i32
    return %c0_i32, %arg0 : i32, i32
  }
}

</mosaic_0001>

<bundles_post_ra>
// kernel: tpu_custom_call.1
= control target key start
LH: loop header
LB: loop body
LE: loop exit
PB: predicated region body
PF: predicated region fallthrough
CT: control target
= control target key end

     0   :  { %s286_s0 = inlined_call_operand.vmem [shape: f32[2,128], index: 0, kind: input, shape index: {}]   ;;  %s287_s1 = inlined_call_operand.vmem [shape: f32[32,2], index: 1, kind: input, shape index: {}]   ;;  %s288_s2 = inlined_call_operand.vmem [shape: f32[32,1], index: 2, kind: input, shape index: {}]   ;;  %s289_s3 = inlined_call_operand.vmem [shape: f32[32,1], index: 3, kind: input, shape index: {}]   ;;  %s290_s4 = inlined_call_operand.<no memory space> [shape: f32[1,1], index: 4, kind: input, shape index: {}]   ;;  %s291_s5 = inlined_call_operand.hbm [shape: f32[1,128], index: 5, kind: output, shape index: {}]  }
   0x1   :  { %v10_v0 = vstv %s290_s4 }
   0x2   :  { %11 = vst [vmem:[#allocation2] sm:$0x1] %v10_v0 }
   0x3   :  { %v26_v1 = vld [vmem:[%s287_s1 + $0x10] sm:$0xff]  ;;  %v208_v2 = vmov 1   ;;  %v209_v3 = vmov 0   ;;  %v24_v4 = vld [vmem:[%s287_s1] sm:$0xff] }
   0x4   :  { %177 = vset.pattern.permute.xlu0 %v208_v2  ;;  %175 = vset.pattern.permute.xlu1 %v209_v3 }
   0x5   :  { %71 = vperm.xlu0 %177, %v26_v1   ;;  %49 = vperm.xlu1 %175, %v26_v1  }
   0x6   :  { %176 = vset.pattern.permute.xlu2 %v208_v2 }
   0x7   :  { %12 = vsyncpa [#allocation4], 0  ;;  %63 = vperm.xlu2 %176, %v24_v4   ;;  %v27_v5 = vld [vmem:[%s287_s1 + $0x18] sm:$0xff]  ;;  %v25_v6 = vld [vmem:[%s287_s1 + $0x8] sm:$0xff]  ;;  %s163_s20 = sshll.u32 %s291_s5, 4  ;;  %s164_s20 = int_to_ptr.hbm [resolvable:$true] %s163_s20 }
   0x8   :  { %v28_v7 = vld [vmem:[%s288_s2] sm:$0xff]  ;;  %v31_v8 = vld [vmem:[%s288_s2 + $0x18] sm:$0xff]  ;;  %v29_v9 = vld [vmem:[%s288_s2 + $0x8] sm:$0xff] }
   0x9   :  { %v30_v10 = vld [vmem:[%s288_s2 + $0x10] sm:$0xff]  ;;  %v36_v11 = vld [vmem:[#allocation2] sm:$0x1]  ;;  %v33_v13 = vld [vmem:[%s289_s3 + $0x8] sm:$0xff] }
   0xa   :  { %v32_v12 = vld [vmem:[%s289_s3] sm:$0xff]  ;;  %v34_v14 = vld [vmem:[%s289_s3 + $0x10] sm:$0xff]  ;;  %v35_v15 = vld [vmem:[%s289_s3 + $0x18] sm:$0xff] }
   0xb   :  { %v23_v24 = vld [vmem:[%s286_s0] sm:$0x3]  ;;  %s210_s0 = smov [#allocation3]  }
   0xc   :  { %v57_v25 = vperm.slane %v23_v24, 0  ;;  %v78_v28 = vperm.slane %v23_v24, 1  ;;  %s161_s3 = sshll.u32 %s210_s0, 4  ;;  %s162_s3 = int_to_ptr.vmem [resolvable:$true] %s161_s3 }
   0xd   :  { %178 = vset.pattern.permute.xlu0 %v209_v3  ;;  %54 = vperm.xlu1 %175, %v27_v5  }
   0xe   :  { %39 = vperm.xlu0 %178, %v24_v4  }
   0xf   :  { %67 = vperm.xlu2 %176, %v25_v6  }
  0x15   :  { %179 = vset.pattern.permute.xlu1 %v208_v2 }
  0x16   :  { %75 = vperm.xlu1 %179, %v27_v5   ;;  %44 = vperm.xlu0 %178, %v25_v6  }
  0x17   :  { %180 = vset.pattern.permute.xlu2 %v209_v3 }
  0x18   :  { %89 = vperm.xlu2 %180, %v28_v7  }
  0x1e   :  { %181 = vset.pattern.permute.xlu1 %v209_v3  ;;  %104 = vperm.xlu0 %178, %v31_v8  }
  0x1f   :  { %94 = vperm.xlu1 %181, %v29_v9  }
  0x20   :  { %99 = vperm.xlu2 %180, %v30_v10  }
  0x26   :  { %150 = vperm.xlu0 %178, %v36_v11  }
  0x27   :  { %117 = vperm.xlu1 %181, %v32_v12  }
  0x28   :  { %122 = vperm.xlu2 %180, %v33_v13  }
  0x2f   :  { %127 = vperm.xlu1 %181, %v34_v14  }
  0x30   :  { %132 = vperm.xlu2 %180, %v35_v15  }
  0x61   :  { %v64_v16 = vpop.permute.xlu2 %63 }
  0x62   :  { %v79_v31 = vmul.f32 %v78_v28, %v64_v16 }
  0x69   :  { %v68_v18 = vpop.permute.xlu2 %67 }
  0x6a   :  { %v80_v33 = vmul.f32 %v78_v28, %v68_v18 }
  0x72   :  { %v90_v21 = vpop.permute.xlu2 %89 }
  0x77   :  { %v50_v17 = vpop.permute.xlu1 %49  ;;  %v72_v19 = vpop.permute.xlu0 %71 }
  0x78   :  { %v81_v34 = vmul.f32 %v78_v28, %v72_v19  ;;  %v60_v35 = vmul.f32 %v57_v25, %v50_v17 }
  0x7a   :  { %v100_v26 = vpop.permute.xlu2 %99  ;;  %v85_v39 = vadd.f32 %v81_v34, %v60_v35 }
  0x7c   :  { %v109_v47 = vadd.f32 %v100_v26, %v85_v39 }
  0x7e   :  { %v113_v52 = vmax.f32 %v109_v47, 0.0 }
  0x7f   :  { %v55_v20 = vpop.permute.xlu1 %54 }
  0x80   :  { %v40_v22 = vpop.permute.xlu0 %39  ;;  %v61_v40 = vmul.f32 %v57_v25, %v55_v20 }
  0x81   :  { %v58_v29 = vmul.f32 %v57_v25, %v40_v22 }
  0x82   :  { %v123_v41 = vpop.permute.xlu2 %122 }
  0x83   :  { %v83_v36 = vadd.f32 %v79_v31, %v58_v29 }
  0x85   :  { %v107_v43 = vadd.f32 %v90_v21, %v83_v36 }
  0x87   :  { %v111_v50 = vmax.f32 %v107_v43, 0.0 }
  0x88   :  { %v76_v23 = vpop.permute.xlu1 %75  ;;  %v45_v27 = vpop.permute.xlu0 %44 }
  0x89   :  { %v59_v32 = vmul.f32 %v57_v25, %v45_v27  ;;  %v82_v37 = vmul.f32 %v78_v28, %v76_v23 }
  0x8a   :  { %v133_v58 = vpop.permute.xlu2 %132 }
  0x8b   :  { %v84_v38 = vadd.f32 %v80_v33, %v59_v32  ;;  %v86_v46 = vadd.f32 %v82_v37, %v61_v40 }
  0x90   :  { %v105_v44 = vpop.permute.xlu0 %104 }
  0x91   :  { %v95_v30 = vpop.permute.xlu1 %94  ;;  %v110_v48 = vadd.f32 %v105_v44, %v86_v46 }
  0x92   :  { %v108_v42 = vadd.f32 %v95_v30, %v84_v38 }
  0x93   :  { %v114_v53 = vmax.f32 %v110_v48, 0.0 }
  0x94   :  { %v112_v49 = vmax.f32 %v108_v42, 0.0 }
  0x95   :  { %v138_v59 = vmul.f32 %v133_v58, %v114_v53 }
  0x96   :  { %v136_v54 = vmul.f32 %v123_v41, %v112_v49 }
  0x98   :  { %v151_v2 = vpop.permute.xlu0 %150 }
  0x99   :  { %v118_v45 = vpop.permute.xlu1 %117  ;;  %v153_v4 = vperm.slane %v151_v2, 0 }
  0x9a   :  { %v135_v51 = vmul.f32 %v118_v45, %v111_v50 }
  0x9c   :  { %v139_v56 = vadd.f32 %v136_v54, %v135_v51 }
  0xa1   :  { %v128_v55 = vpop.permute.xlu1 %127 }
  0xa2   :  { %v137_v57 = vmul.f32 %v128_v55, %v113_v52 }
  0xa4   :  { %v140_v60 = vadd.f32 %v139_v56, %v137_v57 }
  0xa6   :  { %v141_v61 = vadd.f32 %v140_v60, %v138_v59 }
  0xa8   :  { %v142_v62 = vrot.slane %v141_v61, 4 }
  0xaa   :  { %v143_v63 = vadd.f32 %v142_v62, %v141_v61 }
  0xac   :  { %v144_v0 = vrot.slane %v143_v63, 2 }
  0xae   :  { %v145_v1 = vadd.f32 %v144_v0, %v143_v63 }
  0xb0   :  { %v146_v3 = vrot.slane %v145_v1, 1 }
  0xb2   :  { %v147_v5 = vadd.f32 %v146_v3, %v145_v1 }
  0xb4   :  { %v154_v6 = vadd.f32 %v153_v4, %v147_v5 }
  0xb6   :  { %155 = vst [vmem:[#allocation3] sm:$0x1] %v154_v6 }
  0xb7   :  { %166 = dma.vmem_to_hbm [thread:$0]  %s162_s3, 16, %s164_s20, [#allocation4]  }
  0xb8   :  { %206 = dma.done.wait [#allocation4], 16  }
  0xb9   :  { %207 = vsyncadd [#allocation4], 4294967280 }
  0xba   :  { %171 = vsyncpa [#allocation4], 1 }

</bundles_post_ra>
